<compile_context>
chip_gen: v5e
topology: v5e:2x2
jax: 0.10.0
libtpu: 0.0.40
codegen_flags: <defaults>
</compile_context>

<pallas_src>
import functools

import numpy as np
import jax
import jax.numpy as jnp
from jax.experimental import pallas as pl
from jax.experimental.pallas import tpu as pltpu


def _round_up(x, m):
    return (x + m - 1) // m * m


def _default_vmem_limit_bytes():
    """~100 MiB on 128-MiB-VMEM chips (v5e/v6e), ~56 MiB on v7x (64 MiB)."""
    try:
        cap = pltpu.get_tpu_info().vmem_capacity_bytes
    except Exception:
        cap = 64 * 1024 * 1024
    return int(min(cap - 8 * 1024 * 1024, 100 * 1024 * 1024))


def prepare_cp_weights(wa, wb, wc, *, bond_dim, output_dimension, dtype=None):
    """Pack the three Linear weights into one (D_in, N_pad) matrix, once.

    wa/wb are PyTorch-Linear weights of shape (8*bond, D_in) with row index
    z*bond + d (resp. o*bond + d); wc has shape (T*bond, D_in) with row index
    t*bond + d, T = output_dimension // 64.  Columns of the packed matrix are
    reordered d-major so the kernel can take contiguous per-d slices:
        col a(z,d) = d*8 + z
        col b(o,d) = 8*bond + d*8 + o
        col c(t,d) = 16*bond + d*T + t
    The column count bond*(16+T) is zero-padded to a multiple of 128.
    Pass dtype=jnp.bfloat16 to halve weight HBM/VMEM and get bf16 MXU rate.
    """
    assert output_dimension % 64 == 0
    t_factor = output_dimension // 64

    # Row permutations: new index (d-major) -> old row index (factor-major).
    perm_ab = np.arange(8 * bond_dim).reshape(8, bond_dim).T.reshape(-1)
    perm_c = np.arange(t_factor * bond_dim).reshape(t_factor, bond_dim).T.reshape(-1)

    wa_p = jnp.asarray(wa)[perm_ab].T      # (D_in, 8*bond)
    wb_p = jnp.asarray(wb)[perm_ab].T      # (D_in, 8*bond)
    wc_p = jnp.asarray(wc)[perm_c].T       # (D_in, T*bond)

    w = jnp.concatenate([wa_p, wb_p, wc_p], axis=1)   # (D_in, bond*(16+T))
    n_pack = w.shape[1]
    n_pad = _round_up(n_pack, 128)
    if n_pad != n_pack:
        w = jnp.pad(w, ((0, 0), (0, n_pad - n_pack)))
    if dtype is not None:
        w = w.astype(dtype)
    return w


def _cp_projection_kernel(x_ref, w_ref, o_ref, *, bond_dim, t_factor, d_out):
    bond, t = bond_dim, t_factor
    tm = x_ref.shape[0]
    d_out_pad = o_ref.shape[1]

    x = x_ref[...]
    if x.dtype != w_ref.dtype:
        x = x.astype(w_ref.dtype)          # in-kernel cast (no HBM round trip)

    # One narrow MXU matmul produces every a/b/c factor for this row tile.
    abc = jnp.dot(x, w_ref[...], preferred_element_type=jnp.float32)  # (TM, Npad)

    a_off, b_off, c_off = 0, 8 * bond, 16 * bond

    # bc[d][:, o*T + tt] = b[:, o, d] * c[:, tt, d]   -- (TM, 8T), VPU only.
    bc = []
    for dd in range(bond):
        c_d = abc[:, c_off + dd * t: c_off + (dd + 1) * t]            # (TM, T)
        bc_d = jnp.concatenate(
            [abc[:, b_off + dd * 8 + o: b_off + dd * 8 + o + 1] * c_d
             for o in range(8)],
            axis=1)                                                    # (TM, 8T)
        bc.append(bc_d)

    # out[:, z*8T + o*T + tt] = sum_d a[:, z, d] * bc[d][:, o*T + tt]
    blocks = []
    for z in range(8):
        blk = None
        for dd in range(bond):
            a_col = abc[:, a_off + dd * 8 + z: a_off + dd * 8 + z + 1]  # (TM, 1)
            term = a_col * bc[dd]
            blk = term if blk is None else blk + term
        blocks.append(blk)
    out = jnp.concatenate(blocks, axis=1)                              # (TM, d_out)

    if d_out_pad != d_out:                 # only when output_dimension % 128 != 0
        out = jnp.concatenate(
            [out, jnp.zeros((tm, d_out_pad - d_out), out.dtype)], axis=1)

    o_ref[...] = out.astype(o_ref.dtype)


def _vmem_estimate_bytes(tm, d_in, n_pack_pad, d_out_pad, x_bytes, w_bytes, o_bytes):
    # double-buffered pipeline buffers + f32 in-flight intermediates
    return (2 * tm * d_in * x_bytes
            + 2 * d_in * n_pack_pad * w_bytes
            + 2 * tm * d_out_pad * o_bytes
            + tm * n_pack_pad * 4        # abc
            + 2 * tm * d_out_pad * 4)    # blocks / out headroom


def cp_projection(x, w_pack, *, bond_dim, output_dimension, tm=512,
                  vmem_limit_bytes=None):
    """x: (B, S, D_in); w_pack from prepare_cp_weights()."""
    B, S, D_in = x.shape
    t_factor = output_dimension // 64
    d_out_pad = _round_up(output_dimension, 128)
    n_pack_pad = w_pack.shape[1]
    M = B * S

    limit = int(vmem_limit_bytes or _default_vmem_limit_bytes())

    # Row tile: big for HBM-roofline efficiency, shrunk if VMEM-tight, and at
    # least 2 grid steps when possible so both v7x TensorCores are used.
    tm = max(8, min(_round_up(tm, 8), _round_up(M, 8)))
    while tm > 64 and _vmem_estimate_bytes(
            tm, D_in, n_pack_pad, d_out_pad,
            x.dtype.itemsize, w_pack.dtype.itemsize, x.dtype.itemsize) > 0.8 * limit:
        tm = max(64, _round_up(tm // 2, 8))
    if M > 8 and pl.cdiv(M, tm) < 2:
        tm = max(8, _round_up(pl.cdiv(M, 2), 8))

    x_flat = x.reshape(M, D_in)            # free reshape, no pad / no astype

    kernel = functools.partial(_cp_projection_kernel, bond_dim=bond_dim,
                               t_factor=t_factor, d_out=output_dimension)
    out = pl.pallas_call(
        kernel,
        out_shape=jax.ShapeDtypeStruct((M, d_out_pad), x.dtype),
        grid_spec=pltpu.PrefetchScalarGridSpec(
            num_scalar_prefetch=0,
            grid=(pl.cdiv(M, tm),),
            in_specs=[
                pl.BlockSpec((tm, D_in), lambda i: (i, 0)),       # x rows (tiled)
                pl.BlockSpec(w_pack.shape, lambda i: (0, 0)),     # packed weights (resident, tiny)
            ],
            out_specs=pl.BlockSpec((tm, d_out_pad), lambda i: (i, 0)),
        ),
        compiler_params=pltpu.CompilerParams(
            dimension_semantics=("parallel",),
            vmem_limit_bytes=limit),
    )(x_flat, w_pack)

    if d_out_pad != output_dimension:
        out = out[:, :output_dimension]
    return out.reshape(B, S, output_dimension)


def cp_projection_ref(x, wa, wb, wc, *, bond_dim):
    """Plain-JAX reference reproducing the PyTorch forward exactly."""
    a = x @ wa.T
    b = x @ wb.T
    c = x @ wc.T
    B, S, _ = x.shape
    a = a.reshape(B, S, -1, bond_dim)   # 'b i (z d) -> b i z d'
    b = b.reshape(B, S, -1, bond_dim)   # 'b i (o d) -> b i o d'
    c = c.reshape(B, S, -1, bond_dim)   # 'b i (t d) -> b i t d'
    out = jnp.einsum('bizd,biod,bitd->bizot', a, b, c)
    return out.reshape(B, S, -1)        # 'b i z o t -> b i (z o t)'


if __name__ == "__main__":
    B, S, D_in = 2, 8, 32
    output_dimension = 128            # -> factors = [8, 8, 2]
    bond_dim = 2

    key = jax.random.PRNGKey(0)
    kx, ka, kb, kc = jax.random.split(key, 4)
    scale = 1.0 / np.sqrt(D_in)       # nn.Linear-style uniform init
    wa = jax.random.uniform(ka, (8 * bond_dim, D_in), jnp.float32, -scale, scale)
    wb = jax.random.uniform(kb, (8 * bond_dim, D_in), jnp.float32, -scale, scale)
    wc = jax.random.uniform(
        kc, ((output_dimension // 64) * bond_dim, D_in), jnp.float32, -scale, scale)
    x = jax.random.normal(kx, (B, S, D_in), jnp.float32)

    # One-time host-side weight packing (pass dtype=jnp.bfloat16 for real
    # workloads; kept f32 here so the tolerance check against f32 is exact).
    w_pack = prepare_cp_weights(
        wa, wb, wc, bond_dim=bond_dim, output_dimension=output_dimension)

    out = cp_projection(x, w_pack,
                        bond_dim=bond_dim, output_dimension=output_dimension)
    out = jax.block_until_ready(out)

    ref = cp_projection_ref(x, wa, wb, wc, bond_dim=bond_dim)
    assert out.shape == (B, S, output_dimension)
    np.testing.assert_allclose(np.asarray(out), np.asarray(ref),
                               rtol=1e-3, atol=1e-3)
    print("KERNEL_OK")
</pallas_src>

<mosaic_0001>
module attributes {stable_mosaic.version = 11 : i64} {
  func.func @_cp_projection_kernel(%arg0: i32, %arg1: memref<8x32xf32, #tpu.memory_space<vmem>>, %arg2: memref<32x128xf32, #tpu.memory_space<vmem>>, %arg3: memref<8x128xf32, #tpu.memory_space<vmem>>) attributes {dimension_semantics = [#tpu.dimension_semantics<parallel>], iteration_bounds = array<i64: 2>, scalar_prefetch = 0 : i64, scratch_operands = 0 : i64, tpu.core_type = #tpu.core_type<tc>, window_params = [{transform_indices = @transform_0, window_bounds = array<i64: 8, 32>}, {pipeline_mode = #tpu.pipeline_mode<synchronous>, transform_indices = @transform_1, window_bounds = array<i64: 32, 128>}, {transform_indices = @transform_2, window_bounds = array<i64: 8, 128>}]} {
    %c0 = arith.constant 0 : index
    %c0_0 = arith.constant 0 : index
    %0 = vector.load %arg1[%c0, %c0_0] : memref<8x32xf32, #tpu.memory_space<vmem>>, vector<8x32xf32>
    %c0_1 = arith.constant 0 : index
    %c0_2 = arith.constant 0 : index
    %1 = vector.load %arg2[%c0_1, %c0_2] : memref<32x128xf32, #tpu.memory_space<vmem>>, vector<32x128xf32>
    %cst = arith.constant dense<0.000000e+00> : vector<8x128xf32>
    %2 = tpu.matmul %0, %1, %cst {dimension_numbers = #tpu.dot_dimension_numbers<[1], [0], [0], [1], [0, 0, 1, 1], [], []>} : vector<8x32xf32>, vector<32x128xf32>, vector<8x128xf32> -> vector<8x128xf32>
    %3 = vector.extract_strided_slice %2 {offsets = [0, 32], sizes = [8, 2], strides = [1, 1]} : vector<8x128xf32> to vector<8x2xf32>
    %4 = vector.extract_strided_slice %2 {offsets = [0, 16], sizes = [8, 1], strides = [1, 1]} : vector<8x128xf32> to vector<8x1xf32>
    %5 = vector.broadcast %4 : vector<8x1xf32> to vector<8x2xf32>
    %6 = arith.mulf %5, %3 : vector<8x2xf32>
    %7 = vector.extract_strided_slice %2 {offsets = [0, 17], sizes = [8, 1], strides = [1, 1]} : vector<8x128xf32> to vector<8x1xf32>
    %8 = vector.broadcast %7 : vector<8x1xf32> to vector<8x2xf32>
    %9 = arith.mulf %8, %3 : vector<8x2xf32>
    %10 = vector.extract_strided_slice %2 {offsets = [0, 18], sizes = [8, 1], strides = [1, 1]} : vector<8x128xf32> to vector<8x1xf32>
    %11 = vector.broadcast %10 : vector<8x1xf32> to vector<8x2xf32>
    %12 = arith.mulf %11, %3 : vector<8x2xf32>
    %13 = vector.extract_strided_slice %2 {offsets = [0, 19], sizes = [8, 1], strides = [1, 1]} : vector<8x128xf32> to vector<8x1xf32>
    %14 = vector.broadcast %13 : vector<8x1xf32> to vector<8x2xf32>
    %15 = arith.mulf %14, %3 : vector<8x2xf32>
    %16 = vector.extract_strided_slice %2 {offsets = [0, 20], sizes = [8, 1], strides = [1, 1]} : vector<8x128xf32> to vector<8x1xf32>
    %17 = vector.broadcast %16 : vector<8x1xf32> to vector<8x2xf32>
    %18 = arith.mulf %17, %3 : vector<8x2xf32>
    %19 = vector.extract_strided_slice %2 {offsets = [0, 21], sizes = [8, 1], strides = [1, 1]} : vector<8x128xf32> to vector<8x1xf32>
    %20 = vector.broadcast %19 : vector<8x1xf32> to vector<8x2xf32>
    %21 = arith.mulf %20, %3 : vector<8x2xf32>
    %22 = vector.extract_strided_slice %2 {offsets = [0, 22], sizes = [8, 1], strides = [1, 1]} : vector<8x128xf32> to vector<8x1xf32>
    %23 = vector.broadcast %22 : vector<8x1xf32> to vector<8x2xf32>
    %24 = arith.mulf %23, %3 : vector<8x2xf32>
    %25 = vector.extract_strided_slice %2 {offsets = [0, 23], sizes = [8, 1], strides = [1, 1]} : vector<8x128xf32> to vector<8x1xf32>
    %26 = vector.broadcast %25 : vector<8x1xf32> to vector<8x2xf32>
    %27 = arith.mulf %26, %3 : vector<8x2xf32>
    %28 = tpu.concatenate %6, %9, %12, %15, %18, %21, %24, %27 in 1 : vector<8x2xf32>, vector<8x2xf32>, vector<8x2xf32>, vector<8x2xf32>, vector<8x2xf32>, vector<8x2xf32>, vector<8x2xf32>, vector<8x2xf32> -> vector<8x16xf32>
    %29 = vector.extract_strided_slice %2 {offsets = [0, 34], sizes = [8, 2], strides = [1, 1]} : vector<8x128xf32> to vector<8x2xf32>
    %30 = vector.extract_strided_slice %2 {offsets = [0, 24], sizes = [8, 1], strides = [1, 1]} : vector<8x128xf32> to vector<8x1xf32>
    %31 = vector.broadcast %30 : vector<8x1xf32> to vector<8x2xf32>
    %32 = arith.mulf %31, %29 : vector<8x2xf32>
    %33 = vector.extract_strided_slice %2 {offsets = [0, 25], sizes = [8, 1], strides = [1, 1]} : vector<8x128xf32> to vector<8x1xf32>
    %34 = vector.broadcast %33 : vector<8x1xf32> to vector<8x2xf32>
    %35 = arith.mulf %34, %29 : vector<8x2xf32>
    %36 = vector.extract_strided_slice %2 {offsets = [0, 26], sizes = [8, 1], strides = [1, 1]} : vector<8x128xf32> to vector<8x1xf32>
    %37 = vector.broadcast %36 : vector<8x1xf32> to vector<8x2xf32>
    %38 = arith.mulf %37, %29 : vector<8x2xf32>
    %39 = vector.extract_strided_slice %2 {offsets = [0, 27], sizes = [8, 1], strides = [1, 1]} : vector<8x128xf32> to vector<8x1xf32>
    %40 = vector.broadcast %39 : vector<8x1xf32> to vector<8x2xf32>
    %41 = arith.mulf %40, %29 : vector<8x2xf32>
    %42 = vector.extract_strided_slice %2 {offsets = [0, 28], sizes = [8, 1], strides = [1, 1]} : vector<8x128xf32> to vector<8x1xf32>
    %43 = vector.broadcast %42 : vector<8x1xf32> to vector<8x2xf32>
    %44 = arith.mulf %43, %29 : vector<8x2xf32>
    %45 = vector.extract_strided_slice %2 {offsets = [0, 29], sizes = [8, 1], strides = [1, 1]} : vector<8x128xf32> to vector<8x1xf32>
    %46 = vector.broadcast %45 : vector<8x1xf32> to vector<8x2xf32>
    %47 = arith.mulf %46, %29 : vector<8x2xf32>
    %48 = vector.extract_strided_slice %2 {offsets = [0, 30], sizes = [8, 1], strides = [1, 1]} : vector<8x128xf32> to vector<8x1xf32>
    %49 = vector.broadcast %48 : vector<8x1xf32> to vector<8x2xf32>
    %50 = arith.mulf %49, %29 : vector<8x2xf32>
    %51 = vector.extract_strided_slice %2 {offsets = [0, 31], sizes = [8, 1], strides = [1, 1]} : vector<8x128xf32> to vector<8x1xf32>
    %52 = vector.broadcast %51 : vector<8x1xf32> to vector<8x2xf32>
    %53 = arith.mulf %52, %29 : vector<8x2xf32>
    %54 = tpu.concatenate %32, %35, %38, %41, %44, %47, %50, %53 in 1 : vector<8x2xf32>, vector<8x2xf32>, vector<8x2xf32>, vector<8x2xf32>, vector<8x2xf32>, vector<8x2xf32>, vector<8x2xf32>, vector<8x2xf32> -> vector<8x16xf32>
    %55 = vector.extract_strided_slice %2 {offsets = [0, 0], sizes = [8, 1], strides = [1, 1]} : vector<8x128xf32> to vector<8x1xf32>
    %56 = vector.broadcast %55 : vector<8x1xf32> to vector<8x16xf32>
    %57 = arith.mulf %56, %28 : vector<8x16xf32>
    %58 = vector.extract_strided_slice %2 {offsets = [0, 8], sizes = [8, 1], strides = [1, 1]} : vector<8x128xf32> to vector<8x1xf32>
    %59 = vector.broadcast %58 : vector<8x1xf32> to vector<8x16xf32>
    %60 = arith.mulf %59, %54 : vector<8x16xf32>
    %61 = arith.addf %57, %60 : vector<8x16xf32>
    %62 = vector.extract_strided_slice %2 {offsets = [0, 1], sizes = [8, 1], strides = [1, 1]} : vector<8x128xf32> to vector<8x1xf32>
    %63 = vector.broadcast %62 : vector<8x1xf32> to vector<8x16xf32>
    %64 = arith.mulf %63, %28 : vector<8x16xf32>
    %65 = vector.extract_strided_slice %2 {offsets = [0, 9], sizes = [8, 1], strides = [1, 1]} : vector<8x128xf32> to vector<8x1xf32>
    %66 = vector.broadcast %65 : vector<8x1xf32> to vector<8x16xf32>
    %67 = arith.mulf %66, %54 : vector<8x16xf32>
    %68 = arith.addf %64, %67 : vector<8x16xf32>
    %69 = vector.extract_strided_slice %2 {offsets = [0, 2], sizes = [8, 1], strides = [1, 1]} : vector<8x128xf32> to vector<8x1xf32>
    %70 = vector.broadcast %69 : vector<8x1xf32> to vector<8x16xf32>
    %71 = arith.mulf %70, %28 : vector<8x16xf32>
    %72 = vector.extract_strided_slice %2 {offsets = [0, 10], sizes = [8, 1], strides = [1, 1]} : vector<8x128xf32> to vector<8x1xf32>
    %73 = vector.broadcast %72 : vector<8x1xf32> to vector<8x16xf32>
    %74 = arith.mulf %73, %54 : vector<8x16xf32>
    %75 = arith.addf %71, %74 : vector<8x16xf32>
    %76 = vector.extract_strided_slice %2 {offsets = [0, 3], sizes = [8, 1], strides = [1, 1]} : vector<8x128xf32> to vector<8x1xf32>
    %77 = vector.broadcast %76 : vector<8x1xf32> to vector<8x16xf32>
    %78 = arith.mulf %77, %28 : vector<8x16xf32>
    %79 = vector.extract_strided_slice %2 {offsets = [0, 11], sizes = [8, 1], strides = [1, 1]} : vector<8x128xf32> to vector<8x1xf32>
    %80 = vector.broadcast %79 : vector<8x1xf32> to vector<8x16xf32>
    %81 = arith.mulf %80, %54 : vector<8x16xf32>
    %82 = arith.addf %78, %81 : vector<8x16xf32>
    %83 = vector.extract_strided_slice %2 {offsets = [0, 4], sizes = [8, 1], strides = [1, 1]} : vector<8x128xf32> to vector<8x1xf32>
    %84 = vector.broadcast %83 : vector<8x1xf32> to vector<8x16xf32>
    %85 = arith.mulf %84, %28 : vector<8x16xf32>
    %86 = vector.extract_strided_slice %2 {offsets = [0, 12], sizes = [8, 1], strides = [1, 1]} : vector<8x128xf32> to vector<8x1xf32>
    %87 = vector.broadcast %86 : vector<8x1xf32> to vector<8x16xf32>
    %88 = arith.mulf %87, %54 : vector<8x16xf32>
    %89 = arith.addf %85, %88 : vector<8x16xf32>
    %90 = vector.extract_strided_slice %2 {offsets = [0, 5], sizes = [8, 1], strides = [1, 1]} : vector<8x128xf32> to vector<8x1xf32>
    %91 = vector.broadcast %90 : vector<8x1xf32> to vector<8x16xf32>
    %92 = arith.mulf %91, %28 : vector<8x16xf32>
    %93 = vector.extract_strided_slice %2 {offsets = [0, 13], sizes = [8, 1], strides = [1, 1]} : vector<8x128xf32> to vector<8x1xf32>
    %94 = vector.broadcast %93 : vector<8x1xf32> to vector<8x16xf32>
    %95 = arith.mulf %94, %54 : vector<8x16xf32>
    %96 = arith.addf %92, %95 : vector<8x16xf32>
    %97 = vector.extract_strided_slice %2 {offsets = [0, 6], sizes = [8, 1], strides = [1, 1]} : vector<8x128xf32> to vector<8x1xf32>
    %98 = vector.broadcast %97 : vector<8x1xf32> to vector<8x16xf32>
    %99 = arith.mulf %98, %28 : vector<8x16xf32>
    %100 = vector.extract_strided_slice %2 {offsets = [0, 14], sizes = [8, 1], strides = [1, 1]} : vector<8x128xf32> to vector<8x1xf32>
    %101 = vector.broadcast %100 : vector<8x1xf32> to vector<8x16xf32>
    %102 = arith.mulf %101, %54 : vector<8x16xf32>
    %103 = arith.addf %99, %102 : vector<8x16xf32>
    %104 = vector.extract_strided_slice %2 {offsets = [0, 7], sizes = [8, 1], strides = [1, 1]} : vector<8x128xf32> to vector<8x1xf32>
    %105 = vector.broadcast %104 : vector<8x1xf32> to vector<8x16xf32>
    %106 = arith.mulf %105, %28 : vector<8x16xf32>
    %107 = vector.extract_strided_slice %2 {offsets = [0, 15], sizes = [8, 1], strides = [1, 1]} : vector<8x128xf32> to vector<8x1xf32>
    %108 = vector.broadcast %107 : vector<8x1xf32> to vector<8x16xf32>
    %109 = arith.mulf %108, %54 : vector<8x16xf32>
    %110 = arith.addf %106, %109 : vector<8x16xf32>
    %111 = tpu.concatenate %61, %68, %75, %82, %89, %96, %103, %110 in 1 : vector<8x16xf32>, vector<8x16xf32>, vector<8x16xf32>, vector<8x16xf32>, vector<8x16xf32>, vector<8x16xf32>, vector<8x16xf32>, vector<8x16xf32> -> vector<8x128xf32>
    %c0_3 = arith.constant 0 : index
    %c0_4 = arith.constant 0 : index
    %112 = vector.load %arg3[%c0_3, %c0_4] : memref<8x128xf32, #tpu.memory_space<vmem>>, vector<8x128xf32>
    tpu.vector_store %arg3[%c0_3, %c0_4], %111 {strides = array<i32>} : memref<8x128xf32, #tpu.memory_space<vmem>>, vector<8x128xf32>,
    return
  }
  func.func @transform_0(%arg0: i32) -> (i32, i32) {
    %c0_i32 = arith.constant 0 : i32
    %c0_i32_0 = arith.constant 0 : i32
    return %arg0, %c0_i32 : i32, i32
  }
  func.func @transform_1(%arg0: i32) -> (i32, i32) {
    %c0_i32 = arith.constant 0 : i32
    %c0_i32_0 = arith.constant 0 : i32
    %c0_i32_1 = arith.constant 0 : i32
    return %c0_i32, %c0_i32_0 : i32, i32
  }
  func.func @transform_2(%arg0: i32) -> (i32, i32) {
    %c0_i32 = arith.constant 0 : i32
    %c0_i32_0 = arith.constant 0 : i32
    return %arg0, %c0_i32 : i32, i32
  }
}

</mosaic_0001>

<bundles_post_ra>
// kernel: tpu_custom_call.1
= control target key start
LH: loop header
LB: loop body
LE: loop exit
PB: predicated region body
PF: predicated region fallthrough
CT: control target
= control target key end

     0   :  { %7 = vsyncpa [#allocation3], 0  ;;  %s1162_s0 = inlined_call_operand.hbm [shape: f32[16,32], index: 0, kind: input, shape index: {}]   ;;  %s1163_s1 = inlined_call_operand.hbm [shape: f32[32,128], index: 1, kind: input, shape index: {}]   ;;  %s1164_s2 = inlined_call_operand.hbm [shape: f32[16,128], index: 2, kind: output, shape index: {}]  }
   0x1   :  { %9 = vsyncpa [#allocation3 + $0x1], 0 }
   0x2   :  { %10 = vsyncpa [#allocation6], 0 }
   0x3   :  { %11 = vsyncpa [#allocation4], 0 }
   0x4   :  { %13 = vsyncpa [#allocation4 + $0x1], 0  ;;  %s950_s9 = smov 0   ;;  %s952_s10 = smov 0  }
   0x5   :  { %s954_s11 = smov 0   ;;  %s956_s12 = smov 0  }
   0x6 LB: > { %s108_s15 = sshll.u32 %s1163_s1, 4  ;;  %s974_s16 = sadd.s32 4294967295, %s883_s12   ;;  %s883_s12 = sphi %s956_s12, %s1174_s12   ;;  %s879_s11 = sphi %s954_s11, %s1173_s11   ;;  %s875_s10 = sphi %s952_s10, %s1172_s10   ;;  %s871_s9 = sphi %s950_s9, %s1171_s9   ;;  %s109_s15 = int_to_ptr.hbm [resolvable:$true] %s108_s15 }
   0x7   : > { %p600_p0 = scmp.ge.s32.totalorder %s883_s12, 1  ;;  %p40_p1 = scmp.eq.s32.totalorder %s974_s16, 0 }
   0x8   : > { %p97_p2 = scmp.lt.s32.totalorder %s883_s12, 3  ;;  %s885_s18 = smov [#allocation5]  }
   0x9   : > { %s110_s19 = sshll.u32 %s885_s18, 4  ;;  %s886_s20 = smov 128   ;;  %s111_s19 = int_to_ptr.vmem [resolvable:$true] %s110_s19 }
   0xa   : > { %p979_p3 = pnand %p600_p0, %p97_p2  ;;  %s887_s21 = smov 8  }
   0xb   : > { %s599_s22 = sadd.s32 4294967294, %s883_s12   ;;  %s990_s23 = sadd.s32 1, %s883_s12  }
   0xc   : > { %p622_p4 = pneg %p979_p3  ;;  %s26_s24 = sadd.s32 1, %s879_s11 }
   0xd   : > { %s23_s25 = ssub.s32 %s883_s12, %s990_s23  ;;  %p33_p7 = scmp.ne.s32.totalorder %s879_s11, %s875_s10 }
   0xe   : > { %p623_p6 = pnand %p622_p4, %p40_p1  ;;  %p24_p8 = scmp.eq.s32.totalorder %s23_s25, 0 }
   0xf   : > { %p34_p9 = scmp.eq.s32.totalorder %s883_s12, 0  ;;  %p39_p10 = scmp.ne.s32.totalorder %s875_s10, %s871_s9 }
  0x10   : > { %625 = dma.hbm_to_vmem [thread:$0]  (!%p623_p6), %s109_s15, 512, %s111_s19, [#allocation6], %s886_s20, %s886_s20, %s887_s21  }
  0x11   : > { %p84_p11 = scmp.eq.s32.totalorder %s974_s16, 1  ;;  %p1006_p12 = por %p40_p1, %p39_p10 }
  0x12   : > { %s1002_s26 = scalar_select %p24_p8, %s879_s11, %s26_s24  }
  0x13   : > { %p1010_p13 = por %p84_p11, %p33_p7  ;;  %p90_p0 = scmp.eq.s32.totalorder %s599_s22, 1 }
  0x14   : > { %p35_p2 = por %p34_p9, %p33_p7  ;;  %s124_s29 = sand.u32 1, %s879_s11  }
  0x15   : > { %p1015_p4 = por %p90_p0, %p39_p10  ;;  %p635_p6 = scmp.lt.s32.totalorder %s883_s12, 2 }
  0x16   : > { %s603_s3 = sshll.u32 %s124_s29, 3  ;;  %s604_s4 = sshll.u32 %s883_s12, 3 }
  0x17   : > { %s132_s7 = scalar_lea.hbm %s1162_s0, %s604_s4  ;;  %s128_s13 = scalar_lea.vmem [#allocation2], %s603_s3 }
  0x18   : > { %s134_s8 = sshll.u32 %s132_s7, 4  ;;  %s136_s14 = sshll.u32 %s128_s13, 4  ;;  %s135_s8 = int_to_ptr.hbm [resolvable:$true] %s134_s8  ;;  %s137_s14 = int_to_ptr.vmem [resolvable:$true] %s136_s14 }
  0x19   : > { %p1024_p8 = pnand %p635_p6, %p35_p2  ;;  %s125_s18 = scalar_lea.sflag [#allocation3], %s124_s29 }
  0x1a   : > { %s783_s19 = sshra.s32 %s135_s8, 4  ;;  %s790_s24 = scalar_lea.hbm %s1162_s0, 16  ;;  %s784_s19 = int_to_ptr.hbm [resolvable:$true] %s783_s19 }
  0x1b   : > { %s785_s20 = scalar_lea.hbm %s784_s19, 8  ;;  %p787_p9 = pneg %p1024_p8 }
  0x1c   : > { %p786_p7 = scmp.ne.s32.totalorder %s784_s19, %s785_s20  ;;  %p791_p0 = scmp.lt.s32.totalorder %s784_s19, %s1162_s0 }
  0x1d   : > { %p792_p2 = scmp.lt.s32.totalorder %s790_s24, %s785_s20 }
  0x1e   : > { %p788_p10 = pnand %p787_p9, %p786_p7 }
  0x1f   : > { %p793_p6 = por %p792_p2, %p791_p0 }
  0x20   : > { %p789_p11 = pneg %p788_p10 }
  0x22   : > { %p794_p5 = pnand %p793_p6, %p789_p11 }
  0x24   : > { %797 = shalt.err (!%p794_p5)
}
  0x25   : > { %629 = dma.hbm_to_vmem [thread:$0]  (!%p1024_p8), %s135_s8, 128, %s137_s14, %s125_s18  }
  0x26   : > { %145 = sbr.rel (%p979_p3) target bundleno = 612 (0x264), region = 28  ;;  %s1041_s29 = sand.u32 (!%p979_p3), 1, %s875_s10  }
  0x27   : > { %s606_s4 = sshll.u32 (!%p979_p3), %s1041_s29, 3  ;;  %s148_s5 = scalar_lea.sflag (!%p979_p3), [#allocation3], %s1041_s29 }
  0x28   : > { %s151_s6 = scalar_lea.vmem (!%p979_p3), [#allocation2], %s606_s4 }
  0x2b   : > { %858 = dma.done.wait (%p1006_p12), %s148_s5, 128  }
  0x2c   : > { %860 = vsyncadd (%p1006_p12), %s148_s5, 4294967168 }
  0x2d   : > { %862 = dma.done.wait (%p40_p1), [#allocation6], 512  }
  0x2e   : > { %864 = vsyncadd (%p40_p1), [#allocation6], 4294966784  ;;  %v888_v0 = vmov 20   ;;  %v889_v1 = vmov 18   ;;  %v890_v2 = vmov 16   ;;  %v182_v3 = vld [vmem:[#allocation5 + $0x18] sm:$0xff] }
  0x2f   : > { %724 = vset.pattern.permute.xlu2 %v888_v0  ;;  %722 = vset.pattern.permute.xlu1 %v889_v1  ;;  %v181_v4 = vld [vmem:[#allocation5 + $0x10] sm:$0xff]  ;;  %v180_v5 = vld [vmem:[#allocation5 + $0x8] sm:$0xff]  ;;  %v179_v6 = vld [vmem:[#allocation5] sm:$0xff]  ;;  %vm183_vm0 = vcmask 261120   ;;  %v891_v9 = vmov 21   ;;  %v892_v10 = vmov 19  }
  0x30   : > { %720 = vset.pattern.permute.xlu0 %v890_v2  ;;  %199 = vmatpush.msra.mxu0 %v182_v3  ;;  %v178_v7 = vld [vmem:[%s151_s6] sm:$0xff]  ;;  %v893_v11 = vmov 17   ;;  %v894_v12 = vmov 23   ;;  %v895_v13 = vmov 22   ;;  %v896_v14 = vmov 25   ;;  %s915_s17 = smov 100  }
  0x31   : > { %v897_v15 = vmov 24   ;;  %v898_v16 = vmov 26   ;;  %v899_v17 = vmov 30   ;;  %v900_v18 = vmov 27   ;;  %s916_s27 = smov 96   ;;  %s918_s7 = smov 106  }
  0x32   : > { %200 = vmatpush.msra.mxu0 %v181_v4  ;;  %v901_v19 = vmov 28   ;;  %v902_v20 = vmov 8   ;;  %v903_v21 = vmov 29   ;;  %v904_v22 = vmov 31   ;;  %s919_s8 = smov 102   ;;  %s920_s13 = smov 98  }
  0x33   : > { %v905_v23 = vmov 3   ;;  %v906_v24 = vmov 0   ;;  %v907_v25 = vmov 1   ;;  %v908_v26 = vmov 9   ;;  %s922_s14 = smov 94   ;;  %s924_s15 = smov 104  }
  0x34   : > { %201 = vmatpush.msra.mxu0 %v180_v5  ;;  %v909_v27 = vmov 2   ;;  %v910_v28 = vmov 10   ;;  %v911_v29 = vmov 11   ;;  %v912_v30 = vmov 4   ;;  %s925_s18 = smov 108   ;;  %s926_s19 = smov 110  }
  0x35   : > { %v913_v31 = vmov 12   ;;  %v914_v32 = vmov 5   ;;  %v917_v43 = vmov 13   ;;  %v921_v47 = vmov 14   ;;  %s929_s20 = smov 48   ;;  %s930_s21 = smov 32  }
  0x36   : > { %202 = vmatpush.msra.mxu0 %v179_v6  ;;  %v923_v51 = vmov 6   ;;  %v927_v2 = vmov 15   ;;  %v928_v5 = vmov 7   ;;  %vm280_vm1 = vcmask 15360   ;;  %s931_s22 = smov 16   ;;  %s932_s24 = smov 80  }
  0x37   : > { %609 = vmatmul.msk.f32.vlgmr.msra.gmra.mxu0 %vm183_vm0, %v178_v7  ;;  %vm282_vm2 = vcmask 31744   ;;  %vm284_vm3 = vcmask 48128   ;;  %vm286_vm4 = vcmask 64512   ;;  %vm288_vm5 = vcmask 80896   ;;  %s933_s25 = smov 64   ;;  %s934_s3 = smov 112  }
  0x38   : > { %vm290_vm6 = vcmask 97280   ;;  %vm292_vm7 = vcmask 113664   ;;  %vm489_vm8 = vcmask 130048   ;;  %vm492_vm9 = vcmask 392192   ;;  %s611_s5 = sshll.u32 %s974_s16, 3  ;;  %s504_s16 = scalar_lea.sflag [#allocation4], %s1041_s29 }
  0x39   : > { %vm494_vm10 = vcmask 523264   ;;  %vm496_vm11 = vcmask 654336   ;;  %vm498_vm12 = vcmask 785408   ;;  %vm500_vm13 = vcmask 916480  }
  0xb4   : > { %v1056_v8 = vpop.f32.mrf.mxu0 }
  0xb5   : > { %229 = vperm.xlu2 %724, %v1056_v8   ;;  %219 = vperm.xlu1 %722, %v1056_v8  }
  0xb6   : > { %209 = vperm.xlu0 %720, %v1056_v8  }
  0xbd   : > { %725 = vset.pattern.permute.xlu2 %v891_v9  ;;  %723 = vset.pattern.permute.xlu1 %v892_v10 }
  0xbe   : > { %721 = vset.pattern.permute.xlu0 %v893_v11  ;;  %234 = vperm.xlu2 %725, %v1056_v8  }
  0xbf   : > { %224 = vperm.xlu1 %723, %v1056_v8   ;;  %214 = vperm.xlu0 %721, %v1056_v8  }
  0xc6   : > { %727 = vset.pattern.permute.xlu2 %v894_v12 }
  0xc7   : > { %726 = vset.pattern.permute.xlu1 %v895_v13  ;;  %729 = vset.pattern.permute.xlu0 %v896_v14 }
  0xc8   : > { %244 = vperm.xlu2 %727, %v1056_v8   ;;  %239 = vperm.xlu1 %726, %v1056_v8  }
  0xc9   : > { %300 = vperm.xlu0 %729, %v1056_v8  }
  0xd0   : > { %728 = vset.pattern.permute.xlu2 %v897_v15  ;;  %730 = vset.pattern.permute.xlu1 %v898_v16 }
  0xd1   : > { %734 = vset.pattern.permute.xlu0 %v899_v17  ;;  %295 = vperm.xlu2 %728, %v1056_v8  }
  0xd2   : > { %305 = vperm.xlu1 %730, %v1056_v8   ;;  %325 = vperm.xlu0 %734, %v1056_v8  }
  0xd9   : > { %731 = vset.pattern.permute.xlu2 %v900_v18 }
  0xda   : > { %732 = vset.pattern.permute.xlu1 %v901_v19  ;;  %737 = vset.pattern.permute.xlu0 %v902_v20 }
  0xdb   : > { %310 = vperm.xlu2 %731, %v1056_v8   ;;  %315 = vperm.xlu1 %732, %v1056_v8  }
  0xdc   : > { %379 = vperm.xlu0 %737, %v1056_v8  }
  0xe3   : > { %733 = vset.pattern.permute.xlu2 %v903_v21  ;;  %735 = vset.pattern.permute.xlu1 %v904_v22 }
  0xe4   : > { %742 = vset.pattern.permute.xlu0 %v905_v23  ;;  %320 = vperm.xlu2 %733, %v1056_v8  }
  0xe5   : > { %330 = vperm.xlu1 %735, %v1056_v8   ;;  %407 = vperm.xlu0 %742, %v1056_v8  }
  0xec   : > { %736 = vset.pattern.permute.xlu2 %v906_v24 }
  0xed   : > { %738 = vset.pattern.permute.xlu1 %v907_v25  ;;  %374 = vperm.xlu2 %736, %v1056_v8  }
  0xee   : > { %385 = vperm.xlu1 %738, %v1056_v8   ;;  %747 = vset.pattern.permute.xlu0 %v917_v43 }
  0xf5   : > { %739 = vset.pattern.permute.xlu2 %v908_v26 }
  0xf6   : > { %740 = vset.pattern.permute.xlu1 %v909_v27  ;;  %390 = vperm.xlu2 %739, %v1056_v8  }
  0xf7   : > { %396 = vperm.xlu1 %740, %v1056_v8  }
  0xfe   : > { %741 = vset.pattern.permute.xlu2 %v910_v28 }
  0xff   : > { %743 = vset.pattern.permute.xlu1 %v911_v29  ;;  %401 = vperm.xlu2 %741, %v1056_v8  }
 0x100   : > { %412 = vperm.xlu1 %743, %v1056_v8  }
 0x107   : > { %744 = vset.pattern.permute.xlu2 %v912_v30 }
 0x108   : > { %745 = vset.pattern.permute.xlu1 %v913_v31  ;;  %418 = vperm.xlu2 %744, %v1056_v8  }
 0x109   : > { %423 = vperm.xlu1 %745, %v1056_v8  }
 0x10f   : > { %v230_v33 = vpop.permute.xlu2 %229 }
 0x110   : > { %746 = vset.pattern.permute.xlu2 %v914_v32  ;;  %v232_v49 = vmul.f32 %v230_v33, %v1056_v8 }
 0x111   : > { %429 = vperm.xlu2 %746, %v1056_v8   ;;  %748 = vset.pattern.permute.xlu1 %v923_v51 }
 0x118   : > { %v235_v34 = vpop.permute.xlu2 %234 }
 0x119   : > { %v237_v40 = vmul.f32 %v235_v34, %v1056_v8  ;;  %749 = vset.pattern.permute.xlu2 %v921_v47 }
 0x122   : > { %v245_v39 = vpop.permute.xlu2 %244 }
 0x123   : > { %v247_v55 = vmul.f32 %v245_v39, %v1056_v8 }
 0x127   : > { %v220_v35 = vpop.permute.xlu1 %219 }
 0x128   : > { %v222_v36 = vmul.f32 %v220_v35, %v1056_v8  ;;  %v210_v37 = vpop.permute.xlu0 %209 }
 0x129   : > { %v212_v38 = vmul.f32 %v210_v37, %v1056_v8 }
 0x12a   : > { %257 = vrot.lane.b32.xlu2 %v222_v36, %s915_s17 }
 0x12b   : > { %249 = vrot.lane.b32.xlu0 %v212_v38, %s916_s27  ;;  %v296_v46 = vpop.permute.xlu2 %295 }
 0x12c   : > { %v298_v48 = vmul.f32 %v296_v46, %v1056_v8 }
 0x131   : > { %v225_v41 = vpop.permute.xlu1 %224  ;;  %v215_v42 = vpop.permute.xlu0 %214 }
 0x132   : > { %v227_v44 = vmul.f32 %v225_v41, %v1056_v8  ;;  %v217_v45 = vmul.f32 %v215_v42, %v1056_v8  ;;  %269 = vrot.lane.b32.xlu2 %v237_v40, %s918_s7 }
 0x134   : > { %261 = vrot.lane.b32.xlu0 %v227_v44, %s919_s8  ;;  %253 = vrot.lane.b32.xlu1 %v217_v45, %s920_s13 }
 0x135   : > { %v311_v54 = vpop.permute.xlu2 %310 }
 0x136   : > { %v313_v56 = vmul.f32 %v311_v54, %v1056_v8 }
 0x13a   : > { %v240_v50 = vpop.permute.xlu1 %239  ;;  %335 = vrot.lane.b32.xlu2 %v298_v48, %s922_s14 }
 0x13b   : > { %v242_v52 = vmul.f32 %v240_v50, %v1056_v8  ;;  %v301_v53 = vpop.permute.xlu0 %300 }
 0x13c   : > { %265 = vrot.lane.b32.xlu1 %v232_v49, %s924_s15  ;;  %v303_v60 = vmul.f32 %v301_v53, %v1056_v8 }
 0x13d   : > { %273 = vrot.lane.b32.xlu0 %v242_v52, %s925_s18 }
 0x13e   : > { %v321_v61 = vpop.permute.xlu2 %320 }
 0x13f   : > { %v323_v63 = vmul.f32 %v321_v61, %v1056_v8 }
 0x144   : > { %v306_v57 = vpop.permute.xlu1 %305  ;;  %277 = vrot.lane.b32.xlu1 %v247_v55, %s926_s19  ;;  %v326_v59 = vpop.permute.xlu0 %325  ;;  %s833_s19 = scalar_lea.hbm %s1164_s2, 16 }
 0x145   : > { %v308_v58 = vmul.f32 %v306_v57, %v1056_v8  ;;  %347 = vrot.lane.b32.xlu0 %v313_v56, %s915_s17  ;;  %v328_v62 = vmul.f32 %v326_v59, %v1056_v8 }
 0x147   : > { %343 = vrot.lane.b32.xlu2 %v308_v58, %s920_s13  ;;  %v375_v6 = vpop.permute.xlu2 %374 }
 0x14c   : > { %339 = vrot.lane.b32.xlu1 %v303_v60, %s916_s27 }
 0x14d   : > { %359 = vrot.lane.b32.xlu0 %v328_v62, %s918_s7  ;;  %v316_v0 = vpop.permute.xlu1 %315  ;;  %s177_s7 = scalar_lea.vmem [#allocation7], %s606_s4 }
 0x14e   : > { %v318_v1 = vmul.f32 %v316_v0, %v1056_v8  ;;  %v380_v13 = vpop.permute.xlu0 %379 }
 0x14f   : > { %355 = vrot.lane.b32.xlu2 %v323_v63, %s924_s15 }
 0x150   : > { %v391_v9 = vpop.permute.xlu2 %390 }
 0x154   : > { %351 = vrot.lane.b32.xlu1 %v318_v1, %s919_s8  ;;  %s516_s8 = sshll.u32 %s177_s7, 4  ;;  %s517_s8 = int_to_ptr.vmem [resolvable:$true] %s516_s8 }
 0x155   : > { %434 = vperm.xlu0 %747, %v1056_v8  }
 0x157   : > { %445 = vperm.xlu2 %749, %v1056_v8   ;;  %v331_v3 = vpop.permute.xlu1 %330  ;;  %v408_v16 = vpop.permute.xlu0 %407 }
 0x158   : > { %v333_v4 = vmul.f32 %v331_v3, %v1056_v8 }
 0x159   : > { %v402_v11 = vpop.permute.xlu2 %401 }
 0x15c   : > { %440 = vperm.xlu1 %748, %v1056_v8  }
 0x15d   : > { %752 = vset.pattern.permute.xlu0 %v927_v2 }
 0x15f   : > { %751 = vset.pattern.permute.xlu2 %v927_v2 }
 0x160   : > { %456 = vperm.xlu2 %751, %v1056_v8   ;;  %v386_v7 = vpop.permute.xlu1 %385 }
 0x162   : > { %v1116_v14 = vpop.permute.xlu2 %418 }
 0x164   : > { %363 = vrot.lane.b32.xlu1 %v333_v4, %s925_s18 }
 0x165   : > { %750 = vset.pattern.permute.xlu1 %v928_v5 }
 0x169   : > { %v397_v10 = vpop.permute.xlu1 %396 }
 0x16b   : > { %v1120_v17 = vpop.permute.xlu2 %429 }
 0x16c   : > { %451 = vperm.xlu1 %750, %v1056_v8  }
 0x172   : > { %v413_v12 = vpop.permute.xlu1 %412 }
 0x17b   : > { %v1118_v15 = vpop.permute.xlu1 %423 }
 0x184   : > { %v258_v20 = vpop.permute.xlu2 %257 }
 0x18c   : > { %v270_v8 = vpop.permute.xlu2 %269 }
 0x194   : > { %v336_v26 = vpop.permute.xlu2 %335 }
 0x19d   : > { %v250_v19 = vpop.permute.xlu0 %249 }
 0x1a1   : > { %v344_v29 = vpop.permute.xlu2 %343 }
 0x1a6   : > { %v254_v18 = vpop.permute.xlu1 %253  ;;  %v262_v22 = vpop.permute.xlu0 %261 }
 0x1a7   : > { %v281_v27 = vsel %vm280_vm1, %v250_v19, %v254_v18 }
 0x1a8   : > { %v283_v30 = vsel %vm282_vm2, %v281_v27, %v258_v20 }
 0x1a9   : > { %v285_v33 = vsel %vm284_vm3, %v283_v30, %v262_v22  ;;  %v356_v40 = vpop.permute.xlu2 %355 }
 0x1ae   : > { %v266_v21 = vpop.permute.xlu1 %265 }
 0x1af   : > { %v274_v25 = vpop.permute.xlu0 %273  ;;  %v287_v35 = vsel %vm286_vm4, %v285_v33, %v266_v21 }
 0x1b0   : > { %v289_v38 = vsel %vm288_vm5, %v287_v35, %v270_v8 }
 0x1b1   : > { %v291_v41 = vsel %vm290_vm6, %v289_v38, %v274_v25  ;;  %v446_v60 = vpop.permute.xlu2 %445 }
 0x1b6   : > { %v278_v23 = vpop.permute.xlu1 %277 }
 0x1b7   : > { %v348_v31 = vpop.permute.xlu0 %347  ;;  %v293_v44 = vsel %vm292_vm7, %v291_v41, %v278_v23 }
 0x1b8   : > { %v410_v48 = vmul.f32 %v408_v16, %v293_v44  ;;  %v399_v49 = vmul.f32 %v397_v10, %v293_v44  ;;  %v388_v52 = vmul.f32 %v386_v7, %v293_v44  ;;  %v377_v54 = vmul.f32 %v375_v6, %v293_v44 }
 0x1b9   : > { %v432_v2 = vmul.f32 %v1120_v17, %v293_v44  ;;  %v421_v3 = vmul.f32 %v1116_v14, %v293_v44 }
 0x1ba   : > { %v457_v10 = vpop.permute.xlu2 %456 }
 0x1be   : > { %v340_v24 = vpop.permute.xlu1 %339 }
 0x1bf   : > { %v366_v32 = vsel %vm280_vm1, %v336_v26, %v340_v24  ;;  %v360_v42 = vpop.permute.xlu0 %359 }
 0x1c0   : > { %v367_v34 = vsel %vm282_vm2, %v366_v32, %v344_v29 }
 0x1c1   : > { %v368_v37 = vsel %vm284_vm3, %v367_v34, %v348_v31 }
 0x1c6   : > { %v352_v28 = vpop.permute.xlu1 %351 }
 0x1c7   : > { %v369_v39 = vsel %vm286_vm4, %v368_v37, %v352_v28  ;;  %v435_v61 = vpop.permute.xlu0 %434 }
 0x1c8   : > { %v370_v43 = vsel %vm288_vm5, %v369_v39, %v356_v40 }
 0x1c9   : > { %v371_v46 = vsel %vm290_vm6, %v370_v43, %v360_v42 }
 0x1ce   : > { %v441_v36 = vpop.permute.xlu1 %440 }
 0x1cf   : > { %v443_v1 = vmul.f32 %v441_v36, %v293_v44 }
 0x1d6   : > { %v364_v45 = vpop.permute.xlu1 %363 }
 0x1d7   : > { %v372_v47 = vsel %vm292_vm7, %v371_v46, %v364_v45 }
 0x1d8   : > { %v415_v50 = vmul.f32 %v413_v12, %v372_v47  ;;  %v404_v51 = vmul.f32 %v402_v11, %v372_v47  ;;  %v393_v53 = vmul.f32 %v391_v9, %v372_v47  ;;  %v382_v55 = vmul.f32 %v380_v13, %v372_v47 }
 0x1d9   : > { %v448_v62 = vmul.f32 %v446_v60, %v372_v47  ;;  %v437_v63 = vmul.f32 %v435_v61, %v372_v47  ;;  %v426_v0 = vmul.f32 %v1118_v15, %v372_v47  ;;  %v459_v11 = vmul.f32 %v457_v10, %v372_v47 }
 0x1da   : > { %v416_v56 = vadd.f32 %v415_v50, %v410_v48  ;;  %v405_v57 = vadd.f32 %v404_v51, %v399_v49  ;;  %v394_v58 = vadd.f32 %v393_v53, %v388_v52  ;;  %v383_v59 = vadd.f32 %v382_v55, %v377_v54 }
 0x1db   : > { %v449_v4 = vadd.f32 %v448_v62, %v443_v1  ;;  %v438_v5 = vadd.f32 %v437_v63, %v432_v2  ;;  %v427_v6 = vadd.f32 %v426_v0, %v421_v3 }
 0x1dc   : > { %470 = vrot.lane.b32.xlu2 %v416_v56, %s929_s20  ;;  %466 = vrot.lane.b32.xlu1 %v405_v57, %s930_s21 }
 0x1dd   : > { %462 = vrot.lane.b32.xlu0 %v394_v58, %s931_s22 }
 0x1de   : > { %v452_v7 = vpop.permute.xlu1 %451 }
 0x1df   : > { %v454_v9 = vmul.f32 %v452_v7, %v293_v44 }
 0x1e1   : > { %v460_v12 = vadd.f32 %v459_v11, %v454_v9 }
 0x1e4   : > { %482 = vrot.lane.b32.xlu2 %v449_v4, %s916_s27  ;;  %478 = vrot.lane.b32.xlu1 %v438_v5, %s932_s24  ;;  %s514_s27 = scalar_lea.hbm %s1164_s2, %s611_s5 }
 0x1e5   : > { %474 = vrot.lane.b32.xlu0 %v427_v6, %s933_s25  ;;  %s518_s13 = sshll.u32 %s514_s27, 4  ;;  %s519_s13 = int_to_ptr.hbm [resolvable:$true] %s518_s13 }
 0x1e6   : > { %s827_s14 = sshra.s32 %s519_s13, 4  ;;  %s828_s14 = int_to_ptr.hbm [resolvable:$true] %s827_s14 }
 0x1e7   : > { %s829_s15 = scalar_lea.hbm %s828_s14, 8  ;;  %p834_p12 = scmp.lt.s32.totalorder %s828_s14, %s1164_s2 }
 0x1e8   : > { %p830_p1 = scmp.ne.s32.totalorder %s828_s14, %s829_s15  ;;  %p835_p8 = scmp.lt.s32.totalorder %s833_s19, %s829_s15 }
 0x1ea   : > { %p831_p3 = pnand %p830_p1, %p1010_p13  ;;  %p836_p7 = por %p835_p8, %p834_p12 }
 0x1ec   : > { %p832_p5 = pneg %p831_p3 }
 0x1ed   : > { %486 = vrot.lane.b32.xlu0 %v460_v12, %s934_s3 }
 0x1ee   : > { %p837_p9 = pnand %p836_p7, %p832_p5 }
 0x236   : > { %v471_v16 = vpop.permute.xlu2 %470 }
 0x23e   : > { %v483_v8 = vpop.permute.xlu2 %482 }
 0x24e   : > { %v467_v13 = vpop.permute.xlu1 %466 }
 0x24f   : > { %v463_v14 = vpop.permute.xlu0 %462 }
 0x250   : > { %v490_v15 = vsel %vm489_vm8, %v383_v59, %v463_v14 }
 0x251   : > { %v491_v17 = vsel %vm183_vm0, %v490_v15, %v467_v13 }
 0x252   : > { %v493_v19 = vsel %vm492_vm9, %v491_v17, %v471_v16 }
 0x256   : > { %v479_v20 = vpop.permute.xlu1 %478 }
 0x257   : > { %v475_v18 = vpop.permute.xlu0 %474 }
 0x258   : > { %v495_v21 = vsel %vm494_vm10, %v493_v19, %v475_v18 }
 0x259   : > { %v497_v22 = vsel %vm496_vm11, %v495_v21, %v479_v20 }
 0x25a   : > { %v499_v23 = vsel %vm498_vm12, %v497_v22, %v483_v8 }
 0x25f   : > { %v487_v24 = vpop.permute.xlu0 %486 }
 0x260   : > { %v501_v25 = vsel %vm500_vm13, %v499_v23, %v487_v24 }
 0x261   : > { %502 = vst [vmem:[%s177_s7] sm:$0xff] %v501_v25 }
 0x262   : > { %840 = shalt.err (!%p837_p9)
}
 0x263   : > { %620 = dma.vmem_to_hbm [thread:$0]  (%p1010_p13), %s517_s8, 128, %s519_s13, %s504_s16  }
 0x264 PF: > { %s530_s29 = sand.u32 1, %s871_s9   ;;  %p1170_p10 = scmp.ge.s32.totalorder %s883_s12, 2 }
 0x265   : > { %s531_s22 = scalar_lea.sflag [#allocation4], %s530_s29 }
 0x266   : > { %p631_p11 = pnand %p1170_p10, %p1015_p4 }
 0x268   : > { %p632_p0 = pneg %p631_p11 }
 0x26a   : > { %866 = dma.done.wait (%p632_p0), %s531_s22, 128  }
 0x26b   : > { %868 = vsyncadd (%p632_p0), %s531_s22, 4294967168  ;;  %p16_p2 = scmp.ge.s32.totalorder %s990_s23, 4   ;;  %s1171_s9 = smov %s875_s10 }
 0x26c   : > { %s1172_s10 = smov %s879_s11  ;;  %s1173_s11 = smov %s1002_s26 }
 0x26d   : > { %s1174_s12 = smov %s990_s23  ;;  %18 = sbr.rel (!%p16_p2) target bundleno = 6 (0x6), region = 77 }
 0x272   :  { %537 = vsyncpa [#allocation3], 1 }
 0x273   :  { %539 = vsyncpa [#allocation3 + $0x1], 1 }
 0x274   :  { %540 = vsyncpa [#allocation6], 1 }
 0x275   :  { %541 = vsyncpa [#allocation4], 1 }
 0x276   :  { %543 = vsyncpa [#allocation4 + $0x1], 1 }

</bundles_post_ra>
